<compile_context>
chip_gen: v6e
topology: v6e:2x2x1
jax: 0.10.0
libtpu: 0.0.40
codegen_flags: <defaults>
</compile_context>

<pallas_src>
import jax
import jax.numpy as jnp
from jax.experimental import pallas as pl
from jax.experimental.pallas import tpu as pltpu

EPS = 1e-5  # PyTorch BatchNorm1d default


def lin_norm_act_kernel(x_ref, w_ref, gb_ref, o_ref):
    # Linear. The nn.Linear bias is omitted: under training-mode BatchNorm the
    # per-column bias is exactly cancelled by the mean subtraction.
    y = jnp.dot(x_ref[...], w_ref[...], preferred_element_type=jnp.float32)  # (N, TN)

    # BatchNorm1d training-mode statistics over the batch dim. Exact: the full
    # batch N is resident in every column tile (stats are per-column).
    n = y.shape[0]
    inv_n = 1.0 / n
    mean = jnp.sum(y, axis=0, keepdims=True) * inv_n             # (1, TN)
    mean_sq = jnp.sum(y * y, axis=0, keepdims=True) * inv_n      # (1, TN)
    var = jnp.maximum(mean_sq - mean * mean, 0.0)                # biased variance

    # Fold the BN affine into one fused scale/shift (single FMA over the big tile);
    # rsqrt goes to the EUP slot.
    scale = gb_ref[0:1, :] * jax.lax.rsqrt(var + EPS)            # (1, TN) gamma row
    shift = gb_ref[1:2, :] - mean * scale                        # (1, TN) beta row

    # ReLU
    o_ref[...] = jnp.maximum(y * scale + shift, 0.0).astype(o_ref.dtype)


def lin_norm_act(x, weight, bias, gamma, beta, *, tn=128):
    """x: (N, Din) f32; weight: (Dout, Din); bias/gamma/beta: (Dout,)."""
    del bias  # cancelled exactly by training-mode batch normalization
    N, Din = x.shape
    Dout = weight.shape[0]

    # Pad contraction dim and output channels to MXU/lane-friendly multiples of 128.
    din_p = ((Din + 127) // 128) * 128
    dout_p = ((Dout + tn - 1) // tn) * tn

    x_p = x if din_p == Din else jnp.zeros((N, din_p), x.dtype).at[:, :Din].set(x)
    w_t = jnp.zeros((din_p, dout_p), jnp.float32).at[:Din, :Dout].set(weight.T)
    # Pack gamma (row 0) and beta (row 1) into one sublane-aligned array -> one DMA.
    gb = (jnp.zeros((8, dout_p), jnp.float32)
          .at[0, :Dout].set(gamma)
          .at[1, :Dout].set(beta))

    # TODO(synk): BatchNorm1d running_mean/running_var buffer updates are not produced.
    # TODO(synk): very large N would need a 2D grid with cross-tile sum / sum-of-squares
    #             accumulators to keep exact batch statistics; out of scope at these shapes.
    out = pl.pallas_call(
        lin_norm_act_kernel,
        out_shape=jax.ShapeDtypeStruct((N, dout_p), jnp.float32),
        grid_spec=pltpu.PrefetchScalarGridSpec(
            num_scalar_prefetch=0,
            grid=(dout_p // tn,),
            in_specs=[
                # x stays resident across the Dout grid (same block every step)
                pl.BlockSpec((N, din_p), lambda j: (0, 0)),
                # weight columns tiled over Dout -> double-buffered by Pallas
                pl.BlockSpec((din_p, tn), lambda j: (0, j)),
                # packed gamma/beta tile
                pl.BlockSpec((8, tn), lambda j: (0, j)),
            ],
            out_specs=pl.BlockSpec((N, tn), lambda j: (0, j)),
        ),
        compiler_params=pltpu.CompilerParams(
            # BN stats are per-column, so Dout tiles are independent: lets the two
            # TensorCores on v7x split the grid. Harmless on v5e/v6e (single TC).
            dimension_semantics=("parallel",),
        ),
    )(x_p, w_t, gb)
    return out[:, :Dout]


def reference(x, weight, bias, gamma, beta):
    y = x @ weight.T + bias
    mean = jnp.mean(y, axis=0, keepdims=True)
    var = jnp.mean((y - mean) ** 2, axis=0, keepdims=True)
    y = (y - mean) / jnp.sqrt(var + EPS) * gamma + beta
    return jnp.maximum(y, 0.0)


if __name__ == "__main__":
    key = jax.random.PRNGKey(0)
    k_x, k_w, k_b = jax.random.split(key, 3)

    N, Din, Dout = 8, 16, 32

    x = jax.random.normal(k_x, (N, Din), dtype=jnp.float32)

    # Deterministic parameter init (PyTorch nn.Linear-style uniform bound, BN = ones/zeros)
    bound = 1.0 / jnp.sqrt(Din)
    weight = jax.random.uniform(k_w, (Dout, Din), jnp.float32, -bound, bound)
    bias = jax.random.uniform(k_b, (Dout,), jnp.float32, -bound, bound)
    gamma = jnp.ones((Dout,), jnp.float32)
    beta = jnp.zeros((Dout,), jnp.float32)

    out = lin_norm_act(x, weight, bias, gamma, beta)
    out = jax.block_until_ready(out)

    ref = reference(x, weight, bias, gamma, beta)
    assert out.shape == (N, Dout)
    assert jnp.allclose(out, ref, atol=1e-4, rtol=1e-4), "mismatch vs reference"

    print("KERNEL_OK")
</pallas_src>

<mosaic_0001>
module attributes {stable_mosaic.version = 11 : i64} {
  func.func @lin_norm_act_kernel(%arg0: i32, %arg1: memref<8x128xf32, #tpu.memory_space<vmem>>, %arg2: memref<128x128xf32, #tpu.memory_space<vmem>>, %arg3: memref<8x128xf32, #tpu.memory_space<vmem>>, %arg4: memref<8x128xf32, #tpu.memory_space<vmem>>) attributes {dimension_semantics = [#tpu.dimension_semantics<parallel>], iteration_bounds = array<i64: 1>, scalar_prefetch = 0 : i64, scratch_operands = 0 : i64, tpu.core_type = #tpu.core_type<tc>, window_params = [{pipeline_mode = #tpu.pipeline_mode<synchronous>, transform_indices = @transform_0, window_bounds = array<i64: 8, 128>}, {transform_indices = @transform_1, window_bounds = array<i64: 128, 128>}, {transform_indices = @transform_2, window_bounds = array<i64: 8, 128>}, {transform_indices = @transform_3, window_bounds = array<i64: 8, 128>}]} {
    %c0 = arith.constant 0 : index
    %c0_0 = arith.constant 0 : index
    %0 = vector.load %arg1[%c0, %c0_0] : memref<8x128xf32, #tpu.memory_space<vmem>>, vector<8x128xf32>
    %c0_1 = arith.constant 0 : index
    %c0_2 = arith.constant 0 : index
    %1 = vector.load %arg2[%c0_1, %c0_2] : memref<128x128xf32, #tpu.memory_space<vmem>>, vector<128x128xf32>
    %cst = arith.constant dense<0.000000e+00> : vector<8x128xf32>
    %2 = tpu.matmul %0, %1, %cst {dimension_numbers = #tpu.dot_dimension_numbers<[1], [0], [0], [1], [0, 0, 1, 1], [], []>} : vector<8x128xf32>, vector<128x128xf32>, vector<8x128xf32> -> vector<8x128xf32>
    %cst_3 = arith.constant dense<0.000000e+00> : vector<128xf32>
    %3 = vector.multi_reduction <add>, %2, %cst_3 [0] : vector<8x128xf32> to vector<128xf32>
    %4 = vector.shape_cast %3 : vector<128xf32> to vector<1x128xf32>
    %cst_4 = arith.constant 1.250000e-01 : f32
    %5 = vector.broadcast %cst_4 : f32 to vector<1x128xf32>
    %6 = arith.mulf %4, %5 : vector<1x128xf32>
    %7 = arith.mulf %2, %2 : vector<8x128xf32>
    %cst_5 = arith.constant dense<0.000000e+00> : vector<128xf32>
    %8 = vector.multi_reduction <add>, %7, %cst_5 [0] : vector<8x128xf32> to vector<128xf32>
    %9 = vector.shape_cast %8 : vector<128xf32> to vector<1x128xf32>
    %cst_6 = arith.constant 1.250000e-01 : f32
    %10 = vector.broadcast %cst_6 : f32 to vector<1x128xf32>
    %11 = arith.mulf %9, %10 : vector<1x128xf32>
    %12 = arith.mulf %6, %6 : vector<1x128xf32>
    %13 = arith.subf %11, %12 : vector<1x128xf32>
    %cst_7 = arith.constant 0.000000e+00 : f32
    %14 = vector.broadcast %cst_7 : f32 to vector<1x128xf32>
    %15 = arith.maximumf %13, %14 : vector<1x128xf32>
    %c0_8 = arith.constant 0 : index
    %c0_9 = arith.constant 0 : index
    %16 = vector.load %arg3[%c0_8, %c0_9] : memref<8x128xf32, #tpu.memory_space<vmem>>, vector<1x128xf32>
    %cst_10 = arith.constant 9.99999974E-6 : f32
    %17 = vector.broadcast %cst_10 : f32 to vector<1x128xf32>
    %18 = arith.addf %15, %17 : vector<1x128xf32>
    %19 = math.rsqrt %18 : vector<1x128xf32>
    %20 = arith.mulf %16, %19 : vector<1x128xf32>
    %c1 = arith.constant 1 : index
    %c0_11 = arith.constant 0 : index
    %21 = vector.load %arg3[%c1, %c0_11] : memref<8x128xf32, #tpu.memory_space<vmem>>, vector<1x128xf32>
    %22 = arith.mulf %6, %20 : vector<1x128xf32>
    %23 = arith.subf %21, %22 : vector<1x128xf32>
    %24 = vector.broadcast %20 : vector<1x128xf32> to vector<8x128xf32>
    %25 = arith.mulf %2, %24 : vector<8x128xf32>
    %26 = vector.broadcast %23 : vector<1x128xf32> to vector<8x128xf32>
    %27 = arith.addf %25, %26 : vector<8x128xf32>
    %cst_12 = arith.constant 0.000000e+00 : f32
    %28 = vector.broadcast %cst_12 : f32 to vector<8x128xf32>
    %29 = arith.maximumf %27, %28 : vector<8x128xf32>
    %c0_13 = arith.constant 0 : index
    %c0_14 = arith.constant 0 : index
    %30 = vector.load %arg4[%c0_13, %c0_14] : memref<8x128xf32, #tpu.memory_space<vmem>>, vector<8x128xf32>
    tpu.vector_store %arg4[%c0_13, %c0_14], %29 {strides = array<i32>} : memref<8x128xf32, #tpu.memory_space<vmem>>, vector<8x128xf32>,
    return
  }
  func.func @transform_0(%arg0: i32) -> (i32, i32) {
    %c0_i32 = arith.constant 0 : i32
    %c0_i32_0 = arith.constant 0 : i32
    %c0_i32_1 = arith.constant 0 : i32
    return %c0_i32, %c0_i32_0 : i32, i32
  }
  func.func @transform_1(%arg0: i32) -> (i32, i32) {
    %c0_i32 = arith.constant 0 : i32
    %c0_i32_0 = arith.constant 0 : i32
    return %c0_i32, %arg0 : i32, i32
  }
  func.func @transform_2(%arg0: i32) -> (i32, i32) {
    %c0_i32 = arith.constant 0 : i32
    %c0_i32_0 = arith.constant 0 : i32
    return %c0_i32, %arg0 : i32, i32
  }
  func.func @transform_3(%arg0: i32) -> (i32, i32) {
    %c0_i32 = arith.constant 0 : i32
    %c0_i32_0 = arith.constant 0 : i32
    return %c0_i32, %arg0 : i32, i32
  }
}

</mosaic_0001>

<bundles_post_ra>
// kernel: tpu_custom_call.1
= control target key start
LH: loop header
LB: loop body
LE: loop exit
PB: predicated region body
PF: predicated region fallthrough
CT: control target
= control target key end

     0   :  { %8 = vsyncpa [#allocation3], 0  ;;  %s380_s0 = inlined_call_operand.hbm [shape: f32[8,128], index: 0, kind: input, shape index: {}]   ;;  %s381_s1 = inlined_call_operand.hbm [shape: f32[128,128], index: 1, kind: input, shape index: {}]   ;;  %s382_s2 = inlined_call_operand.hbm [shape: f32[8,128], index: 2, kind: input, shape index: {}]   ;;  %s383_s3 = inlined_call_operand.hbm [shape: f32[8,128], index: 3, kind: output, shape index: {}]  }
   0x1   :  { %9 = vsyncpa [#allocation6], 0 }
   0x2   :  { %10 = vsyncpa [#allocation4], 0  ;;  %s340_s12 = smov [#allocation5]  }
   0x3   :  { %s26_s13 = sshll.u32 %s340_s12, 4  ;;  %s27_s13 = int_to_ptr.vmem [resolvable:$true] %s26_s13 }
   0x4   :  { %s262_s14 = scalar_lea.vmem %s27_s13, 2048  ;;  %p267_p1 = scmp.lt.s32.totalorder %s27_s13, %s27_s13 }
   0x5   :  { %p263_p0 = scmp.ne.s32.totalorder %s27_s13, %s262_s14  ;;  %p268_p2 = scmp.lt.s32.totalorder %s262_s14, %s262_s14 }
   0x7   :  { %p269_p3 = por %p268_p2, %p267_p1 }
   0x9   :  { %p270_p4 = pnand %p269_p3, %p263_p0 }
   0xb   :  { %273 = shalt.err (!%p270_p4)
}
   0xc   :  { %s341_s15 = smov 128   ;;  %s342_s16 = smov 8  }
   0xd   :  { %32 = dma.hbm_to_vmem [thread:$0]  %s381_s1, 2048, %s27_s13, [#allocation6], %s341_s15, %s341_s15, %s342_s16  }
   0xe   :  { %s343_s19 = smov [#allocation2]   ;;  %s344_s21 = smov [#allocation7]  }
   0xf   :  { %s17_s20 = sshll.u32 %s343_s19, 4  ;;  %s39_s22 = sshll.u32 %s344_s21, 4  ;;  %s18_s20 = int_to_ptr.vmem [resolvable:$true] %s17_s20  ;;  %s40_s22 = int_to_ptr.vmem [resolvable:$true] %s39_s22 }
  0x10   :  { %s282_s23 = scalar_lea.vmem %s18_s20, 128  ;;  %p287_p6 = scmp.lt.s32.totalorder %s18_s20, %s18_s20 }
  0x11   :  { %p283_p5 = scmp.ne.s32.totalorder %s18_s20, %s282_s23  ;;  %p288_p7 = scmp.lt.s32.totalorder %s282_s23, %s282_s23 }
  0x13   :  { %p289_p8 = por %p288_p7, %p287_p6 }
  0x15   :  { %p290_p9 = pnand %p289_p8, %p283_p5 }
  0x17   :  { %293 = shalt.err (!%p290_p9)
}
  0x18   :  { %20 = dma.hbm_to_vmem [thread:$0]  %s380_s0, 128, %s18_s20, [#allocation3]  }
  0x19   :  { %s302_s26 = scalar_lea.vmem %s40_s22, 128  ;;  %p307_p11 = scmp.lt.s32.totalorder %s40_s22, %s40_s22 }
  0x1a   :  { %p303_p10 = scmp.ne.s32.totalorder %s40_s22, %s302_s26  ;;  %p308_p12 = scmp.lt.s32.totalorder %s302_s26, %s302_s26 }
  0x1c   :  { %p309_p13 = por %p308_p12, %p307_p11 }
  0x1e   :  { %p310_p0 = pnand %p309_p13, %p303_p10 }
  0x20   :  { %313 = shalt.err (!%p310_p0)
}
  0x21   :  { %42 = dma.hbm_to_vmem [thread:$0]  %s382_s2, 128, %s40_s22, [#allocation6]  }
  0x22   :  { %334 = dma.done.wait [#allocation3], 128  }
  0x23   :  { %335 = vsyncadd [#allocation3], 4294967168 }
  0x24   :  { %336 = dma.done.wait [#allocation6], 2176  }
  0x25   :  { %337 = vsyncadd [#allocation6], 4294965120  ;;  %v345_v0 = vmov 0.0   ;;  %vm346_vm0 = vmmov 0   ;;  %v68_v1 = vld [vmem:[#allocation5 + $0x78] sm:$0xff]  ;;  %v67_v2 = vld [vmem:[#allocation5 + $0x70] sm:$0xff]  ;;  %v164_v39 = vlaneseq }
  0x26   :  { %209 = vmatprep.subr.mxu0 %v345_v0  ;;  %241 = vmatprep.mubr.msk.f32.mxu0 %vm346_vm0, %v345_v0  ;;  %v66_v3 = vld [vmem:[#allocation5 + $0x68] sm:$0xff]  ;;  %v65_v4 = vld [vmem:[#allocation5 + $0x60] sm:$0xff]  ;;  %v64_v5 = vld [vmem:[#allocation5 + $0x58] sm:$0xff]  ;;  %s347_s0 = smov [#allocation8]  }
  0x27   :  { %210 = vmatpush3.msra.mxu0 %v68_v1  ;;  %v63_v6 = vld [vmem:[#allocation5 + $0x50] sm:$0xff]  ;;  %v62_v7 = vld [vmem:[#allocation5 + $0x48] sm:$0xff]  ;;  %v61_v8 = vld [vmem:[#allocation5 + $0x40] sm:$0xff]  ;;  %v165_v40 = vshrl.u32 %v164_v39, 7  ;;  %s182_s2 = sshll.u32 %s347_s0, 4  ;;  %s183_s2 = int_to_ptr.vmem [resolvable:$true] %s182_s2 }
  0x28   :  { %211 = vmatprep.subr.mxu0 %v345_v0  ;;  %v60_v9 = vld [vmem:[#allocation5 + $0x38] sm:$0xff]  ;;  %v59_v10 = vld [vmem:[#allocation5 + $0x30] sm:$0xff]  ;;  %v58_v11 = vld [vmem:[#allocation5 + $0x28] sm:$0xff]  ;;  %s314_s28 = scalar_lea.vmem %s183_s2, 128  ;;  %p319_p2 = scmp.lt.s32.totalorder %s183_s2, %s183_s2 }
  0x29   :  { %212 = vmatpush3.msra.mxu0 %v67_v2  ;;  %v57_v12 = vld [vmem:[#allocation5 + $0x20] sm:$0xff]  ;;  %v56_v13 = vld [vmem:[#allocation5 + $0x18] sm:$0xff]  ;;  %v55_v14 = vld [vmem:[#allocation5 + $0x10] sm:$0xff]  ;;  %v166_v42 = vsub.s32 0, %v165_v40  ;;  %p315_p1 = scmp.ne.s32.totalorder %s183_s2, %s314_s28  ;;  %p320_p3 = scmp.lt.s32.totalorder %s314_s28, %s314_s28 }
  0x2a   :  { %213 = vmatprep.subr.mxu0 %v345_v0  ;;  %v54_v15 = vld [vmem:[#allocation5 + $0x8] sm:$0xff]  ;;  %v53_v16 = vld [vmem:[#allocation5] sm:$0xff]  ;;  %v52_v17 = vld [vmem:[#allocation2] sm:$0xff] }
  0x2b   :  { %214 = vmatpush3.msra.mxu0 %v66_v3  ;;  %v157_v41 = vld [vmem:[#allocation7] sm:$0x1]  ;;  %v161_v45 = vld [vmem:[#allocation7 + $0x1] sm:$0x1]  ;;  %p321_p4 = por %p320_p3, %p319_p2 }
  0x2c   :  { %215 = vmatprep.subr.mxu0 %v345_v0 }
  0x2d   :  { %216 = vmatpush3.msra.mxu0 %v65_v4  ;;  %p322_p5 = pnand %p321_p4, %p315_p1 }
  0x2e   :  { %217 = vmatprep.subr.mxu0 %v345_v0 }
  0x2f   :  { %218 = vmatpush3.msra.mxu0 %v64_v5 }
  0x30   :  { %219 = vmatprep.subr.mxu0 %v345_v0 }
  0x31   :  { %220 = vmatpush3.msra.mxu0 %v63_v6 }
  0x32   :  { %221 = vmatprep.subr.mxu0 %v345_v0 }
  0x33   :  { %222 = vmatpush3.msra.mxu0 %v62_v7 }
  0x34   :  { %223 = vmatprep.subr.mxu0 %v345_v0 }
  0x35   :  { %224 = vmatpush3.msra.mxu0 %v61_v8 }
  0x36   :  { %225 = vmatprep.subr.mxu0 %v345_v0 }
  0x37   :  { %226 = vmatpush3.msra.mxu0 %v60_v9 }
  0x38   :  { %227 = vmatprep.subr.mxu0 %v345_v0 }
  0x39   :  { %228 = vmatpush3.msra.mxu0 %v59_v10 }
  0x3a   :  { %229 = vmatprep.subr.mxu0 %v345_v0 }
  0x3b   :  { %230 = vmatpush3.msra.mxu0 %v58_v11 }
  0x3c   :  { %231 = vmatprep.subr.mxu0 %v345_v0 }
  0x3d   :  { %232 = vmatpush3.msra.mxu0 %v57_v12 }
  0x3e   :  { %233 = vmatprep.subr.mxu0 %v345_v0 }
  0x3f   :  { %234 = vmatpush3.msra.mxu0 %v56_v13 }
  0x40   :  { %235 = vmatprep.subr.mxu0 %v345_v0 }
  0x41   :  { %236 = vmatpush3.msra.mxu0 %v55_v14 }
  0x42   :  { %237 = vmatprep.subr.mxu0 %v345_v0 }
  0x43   :  { %238 = vmatpush3.msra.mxu0 %v54_v15 }
  0x44   :  { %239 = vmatprep.subr.mxu0 %v345_v0 }
  0x45   :  { %240 = vmatpush3.msra.mxu0 %v53_v16 }
  0x46   :  { %242 = vmatmul.mubr.f32.vlgmr.msra.gmra.mxu0 %v52_v17 }
 0x106   :  { %v135_v18 = vpop.f32.mrf.mxu0 }
 0x107   :  { %v139_v19 = vrot.slane %v135_v18, 4  ;;  %v146_v20 = vmul.f32 %v135_v18, %v135_v18 }
 0x108   :  { %v243_v21 = vpop.f32.mrf.mxu0 }
 0x109   :  { %v140_v22 = vadd.f32 %v139_v19, %v135_v18  ;;  %v147_v23 = vrot.slane %v146_v20, 4 }
 0x10b   :  { %v141_v24 = vrot.slane %v140_v22, 2  ;;  %v148_v25 = vadd.f32 %v147_v23, %v146_v20 }
 0x10d   :  { %v142_v26 = vadd.f32 %v141_v24, %v140_v22  ;;  %v149_v27 = vrot.slane %v148_v25, 2 }
 0x10f   :  { %v143_v28 = vrot.slane %v142_v26, 1  ;;  %v150_v29 = vadd.f32 %v149_v27, %v148_v25 }
 0x111   :  { %v144_v30 = vadd.f32 %v143_v28, %v142_v26  ;;  %v151_v31 = vrot.slane %v150_v29, 1 }
 0x113   :  { %v145_v32 = vmul.f32 0.125, %v144_v30  ;;  %v152_v33 = vadd.f32 %v151_v31, %v150_v29 }
 0x115   :  { %v153_v34 = vmul.f32 0.125, %v152_v33  ;;  %v154_v35 = vmul.f32 %v145_v32, %v145_v32 }
 0x117   :  { %v155_v36 = vsub.f32 %v153_v34, %v154_v35 }
 0x119   :  { %v156_v37 = vmax.f32 %v155_v36, 0.0 }
 0x11b   :  { %v158_v38 = vadd.f32 1e-05, %v156_v37 }
 0x11d   :  { %252 = vrsqrt.f32 %v158_v38 }
 0x12a   :  { %v253_v43 = vpop.eup %252 }
 0x12b   :  { %v160_v44 = vmul.f32 %v253_v43, %v157_v41 }
 0x12d   :  { %v167_v46 = vrot.slane %v160_v44, %v166_v42  ;;  %v162_v47 = vmul.f32 %v160_v44, %v145_v32 }
 0x12f   :  { %v163_v48 = vsub.f32 %v161_v45, %v162_v47  ;;  %v168_v49 = vmul.f32 %v167_v46, %v135_v18 }
 0x131   :  { %v172_v50 = vrot.slane %v163_v48, %v166_v42 }
 0x133   :  { %v173_v51 = vadd.f32 %v172_v50, %v168_v49 }
 0x135   :  { %v174_v52 = vmax.f32 %v173_v51, 0.0 }
 0x137   :  { %175 = vst [vmem:[#allocation8] sm:$0xff] %v174_v52 }
 0x138   :  { %325 = shalt.err (!%p322_p5)
}
 0x139   :  { %185 = dma.vmem_to_hbm [thread:$0]  %s183_s2, 128, %s383_s3, [#allocation4]  }
 0x13a   :  { %338 = dma.done.wait [#allocation4], 128  }
 0x13b   :  { %339 = vsyncadd [#allocation4], 4294967168 }
 0x13c   :  { %189 = vsyncpa [#allocation3], 1 }
 0x13d   :  { %190 = vsyncpa [#allocation6], 1 }
 0x13e   :  { %191 = vsyncpa [#allocation4], 1 }

</bundles_post_ra>
